<compile_context>
chip_gen: v5e
topology: v5e:2x2
jax: 0.10.0
libtpu: 0.0.40
codegen_flags: <defaults>
</compile_context>

<pallas_src>
import jax
import jax.numpy as jnp
from jax.experimental import pallas as pl
from jax.experimental.pallas import tpu as pltpu


def cardnn_kernel(x_ref, w1_ref, b1_ref, w2_ref, b2_ref, w3_ref, b3_ref, o_ref):
    # Cast to bf16 in-kernel (cheap VPU work hidden under the input DMA).
    x = x_ref[...].astype(jnp.bfloat16)
    # fc1 + relu (bf16 MXU operands, f32 accumulate, f32 elementwise)
    h1 = jnp.dot(x, w1_ref[...], preferred_element_type=jnp.float32)
    h1 = jnp.maximum(h1 + b1_ref[...], 0.0)
    # fc2 + relu
    h2 = jnp.dot(h1.astype(jnp.bfloat16), w2_ref[...],
                 preferred_element_type=jnp.float32)
    h2 = jnp.maximum(h2 + b2_ref[...], 0.0)
    # fc3 logits (narrow: out_f == 36 == full last dim of the output array)
    logits = jnp.dot(h2.astype(jnp.bfloat16), w3_ref[...],
                     preferred_element_type=jnp.float32)
    logits = logits + b3_ref[...]
    # softmax over the feature (lane) axis, exact normalization
    m = jnp.max(logits, axis=-1, keepdims=True)
    e = jnp.exp(logits - m)
    denom = jnp.sum(e, axis=-1, keepdims=True)
    o_ref[...] = (e / denom).astype(o_ref.dtype)


def _round_up(n, m):
    return ((n + m - 1) // m) * m


def _choose_tile(batch, block_b):
    """Pick (tile, padded_batch).  Sublane-aligned; >=2 grid steps when there is
    enough work (v7x megacore); prefers a tile that divides the rounded batch so
    no padded copy of x is materialized."""
    block_b = max(8, (block_b // 8) * 8)
    n = _round_up(max(batch, 8), 8)
    if n <= 8:
        return 8, 8
    # Cap so the grid has at least 2 steps (feeds both TensorCores on v7x).
    cap = max(8, min(block_b, _round_up(pl.cdiv(n, 2), 8)))
    # Prefer an exact divisor of n in [cap/2, cap] -> no batch padding needed.
    for tb in range(cap, max(8, cap // 2) - 1, -8):
        if n % tb == 0:
            return tb, n
    return cap, _round_up(n, cap)


def prepare_params(params):
    """One-time operand prep (hoisted out of the forward path): bf16 weights,
    row-vector f32 biases.  Weights are (in_features, out_features)."""
    w1, b1, w2, b2, w3, b3 = params
    return (
        w1.astype(jnp.bfloat16), b1.reshape(1, -1).astype(jnp.float32),
        w2.astype(jnp.bfloat16), b2.reshape(1, -1).astype(jnp.float32),
        w3.astype(jnp.bfloat16), b3.reshape(1, -1).astype(jnp.float32),
    )


def cardnn_forward(x, prepared, *, block_b=2048):
    """x: (B, in_features) f32.  prepared: output of prepare_params()."""
    w1b, b1r, w2b, b2r, w3b, b3r = prepared
    B, in_f = x.shape
    out_f = w3b.shape[1]

    tb, b_pad = _choose_tile(B, block_b)
    if b_pad != B:
        # TODO(synk): a remainder-only second pallas_call would avoid this copy
        # for ragged batches; only taken when no divisor-tile exists.
        x = jnp.pad(x, ((0, b_pad - B), (0, 0)))
    grid = (b_pad // tb,)

    resident = lambda a: pl.BlockSpec(a.shape, lambda i: (0,) * a.ndim)

    # Explicit VMEM budget: double-buffered x/out tiles + resident weights +
    # generous f32/bf16 temporaries, with headroom.  Portable to v5e (16 MiB
    # scoped default) and v7x (64 MiB physical).
    w_bytes = (w1b.size + w2b.size + w3b.size) * 2 + (b1r.size + b2r.size + b3r.size) * 4
    tile_bytes = 2 * tb * in_f * 4 + 2 * tb * out_f * 4
    temp_bytes = tb * 4 * (128 + 64 + out_f) + tb * 2 * (in_f + 128 + 64)
    vmem_limit = min(int(1.5 * (tile_bytes + temp_bytes + w_bytes)) + (4 << 20), 48 << 20)

    cost = pl.CostEstimate(
        flops=2 * b_pad * (in_f * 128 + 128 * 64 + 64 * out_f),
        transcendentals=b_pad * out_f,
        bytes_accessed=b_pad * (in_f + out_f) * 4 + w_bytes,
    )

    out = pl.pallas_call(
        cardnn_kernel,
        out_shape=jax.ShapeDtypeStruct((b_pad, out_f), jnp.float32),
        grid=grid,
        in_specs=[
            pl.BlockSpec((tb, in_f), lambda i: (i, 0)),   # x: tiled over batch
            resident(w1b), resident(b1r),                 # weights stay in VMEM
            resident(w2b), resident(b2r),
            resident(w3b), resident(b3r),
        ],
        out_specs=pl.BlockSpec((tb, out_f), lambda i: (i, 0)),
        compiler_params=pltpu.CompilerParams(
            dimension_semantics=("parallel",),            # megacore on v7x
            vmem_limit_bytes=vmem_limit),
        cost_estimate=cost,
    )(x, w1b, b1r, w2b, b2r, w3b, b3r)

    return out[:B] if b_pad != B else out


def init_params(key, input_size=36, output_size=36):
    # nn.Linear default init: U(-1/sqrt(fan_in), 1/sqrt(fan_in)); weights kept
    # as (in_features, out_features) = transpose of PyTorch's layout.
    sizes = [(input_size, 128), (128, 64), (64, output_size)]
    params = []
    for fan_in, fan_out in sizes:
        key, kw, kb = jax.random.split(key, 3)
        bound = 1.0 / jnp.sqrt(float(fan_in))
        w = jax.random.uniform(kw, (fan_in, fan_out), jnp.float32, -bound, bound)
        b = jax.random.uniform(kb, (1, fan_out), jnp.float32, -bound, bound)
        params.extend([w, b])
    return tuple(params)


def reference_forward(x, params):
    w1, b1, w2, b2, w3, b3 = params
    h1 = jnp.maximum(x @ w1 + b1, 0.0)
    h2 = jnp.maximum(h1 @ w2 + b2, 0.0)
    logits = h2 @ w3 + b3
    return jax.nn.softmax(logits, axis=1)


if __name__ == "__main__":
    key = jax.random.PRNGKey(0)
    kx, kp, kx2, kx3 = jax.random.split(key, 4)
    input_size, output_size = 36, 36
    params = init_params(kp, input_size, output_size)
    prepared = prepare_params(params)   # one-time prep, outside the call path

    # Test 1: tiny batch from the spec (B=2) — single 8-row padded tile.
    B = 2
    x = jax.random.normal(kx, (B, input_size), jnp.float32)
    out = jax.block_until_ready(cardnn_forward(x, prepared))
    ref = reference_forward(x, params)
    assert out.shape == (B, output_size)
    # bf16 MXU operands => loosened (but tight) tolerances vs f32 reference.
    assert jnp.allclose(out, ref, atol=2e-3, rtol=0.0), "mismatch vs reference (B=2)"
    assert jnp.allclose(jnp.sum(out, axis=1), 1.0, atol=1e-4), "rows must sum to ~1"

    # Test 2: multi-step grid, divisor tile (B=600, tile=200 -> grid=3, no pad).
    B2 = 600
    x2 = jax.random.normal(kx2, (B2, input_size), jnp.float32)
    out2 = jax.block_until_ready(cardnn_forward(x2, prepared, block_b=256))
    ref2 = reference_forward(x2, params)
    assert out2.shape == (B2, output_size)
    assert jnp.allclose(out2, ref2, atol=2e-3, rtol=0.0), "mismatch vs reference (B=600)"
    assert jnp.allclose(jnp.sum(out2, axis=1), 1.0, atol=1e-4), "rows must sum to ~1"

    # Test 3: ragged batch (B=53) — exercises the padded-tile fallback path.
    B3 = 53
    x3 = jax.random.normal(kx3, (B3, input_size), jnp.float32)
    out3 = jax.block_until_ready(cardnn_forward(x3, prepared, block_b=32))
    ref3 = reference_forward(x3, params)
    assert out3.shape == (B3, output_size)
    assert jnp.allclose(out3, ref3, atol=2e-3, rtol=0.0), "mismatch vs reference (B=53)"

    print("KERNEL_OK")
</pallas_src>

<mosaic_0001>
module attributes {stable_mosaic.version = 11 : i64} {
  func.func @cardnn_kernel(%arg0: i32, %arg1: memref<8x36xf32, #tpu.memory_space<vmem>>, %arg2: memref<36x128xbf16, #tpu.memory_space<vmem>>, %arg3: memref<1x128xf32, #tpu.memory_space<vmem>>, %arg4: memref<128x64xbf16, #tpu.memory_space<vmem>>, %arg5: memref<1x64xf32, #tpu.memory_space<vmem>>, %arg6: memref<64x36xbf16, #tpu.memory_space<vmem>>, %arg7: memref<1x36xf32, #tpu.memory_space<vmem>>, %arg8: memref<8x36xf32, #tpu.memory_space<vmem>>) attributes {dimension_semantics = [#tpu.dimension_semantics<parallel>], iteration_bounds = array<i64: 1>, scalar_prefetch = 0 : i64, scratch_operands = 0 : i64, tpu.core_type = #tpu.core_type<tc>, window_params = [{transform_indices = @transform_0, window_bounds = array<i64: 8, 36>}, {pipeline_mode = #tpu.pipeline_mode<synchronous>, transform_indices = @transform_1, window_bounds = array<i64: 36, 128>}, {pipeline_mode = #tpu.pipeline_mode<synchronous>, transform_indices = @transform_2, window_bounds = array<i64: 1, 128>}, {pipeline_mode = #tpu.pipeline_mode<synchronous>, transform_indices = @transform_3, window_bounds = array<i64: 128, 64>}, {pipeline_mode = #tpu.pipeline_mode<synchronous>, transform_indices = @transform_4, window_bounds = array<i64: 1, 64>}, {pipeline_mode = #tpu.pipeline_mode<synchronous>, transform_indices = @transform_5, window_bounds = array<i64: 64, 36>}, {pipeline_mode = #tpu.pipeline_mode<synchronous>, transform_indices = @transform_6, window_bounds = array<i64: 1, 36>}, {transform_indices = @transform_7, window_bounds = array<i64: 8, 36>}]} {
    %c0 = arith.constant 0 : index
    %c0_0 = arith.constant 0 : index
    %0 = vector.load %arg1[%c0, %c0_0] : memref<8x36xf32, #tpu.memory_space<vmem>>, vector<8x36xf32>
    %1 = arith.truncf %0 : vector<8x36xf32> to vector<8x36xbf16>
    %c0_1 = arith.constant 0 : index
    %c0_2 = arith.constant 0 : index
    %2 = vector.load %arg2[%c0_1, %c0_2] : memref<36x128xbf16, #tpu.memory_space<vmem>>, vector<36x128xbf16>
    %cst = arith.constant dense<0.000000e+00> : vector<8x128xf32>
    %3 = tpu.matmul %1, %2, %cst {dimension_numbers = #tpu.dot_dimension_numbers<[1], [0], [0], [1], [0, 0, 1, 1], [], []>} : vector<8x36xbf16>, vector<36x128xbf16>, vector<8x128xf32> -> vector<8x128xf32>
    %c0_3 = arith.constant 0 : index
    %c0_4 = arith.constant 0 : index
    %4 = vector.load %arg3[%c0_3, %c0_4] : memref<1x128xf32, #tpu.memory_space<vmem>>, vector<1x128xf32>
    %5 = vector.broadcast %4 : vector<1x128xf32> to vector<8x128xf32>
    %6 = arith.addf %3, %5 : vector<8x128xf32>
    %cst_5 = arith.constant 0.000000e+00 : f32
    %7 = vector.broadcast %cst_5 : f32 to vector<8x128xf32>
    %8 = arith.maximumf %6, %7 : vector<8x128xf32>
    %9 = arith.truncf %8 : vector<8x128xf32> to vector<8x128xbf16>
    %c0_6 = arith.constant 0 : index
    %c0_7 = arith.constant 0 : index
    %10 = vector.load %arg4[%c0_6, %c0_7] : memref<128x64xbf16, #tpu.memory_space<vmem>>, vector<128x64xbf16>
    %cst_8 = arith.constant dense<0.000000e+00> : vector<8x64xf32>
    %11 = tpu.matmul %9, %10, %cst_8 {dimension_numbers = #tpu.dot_dimension_numbers<[1], [0], [0], [1], [0, 0, 1, 1], [], []>} : vector<8x128xbf16>, vector<128x64xbf16>, vector<8x64xf32> -> vector<8x64xf32>
    %c0_9 = arith.constant 0 : index
    %c0_10 = arith.constant 0 : index
    %12 = vector.load %arg5[%c0_9, %c0_10] : memref<1x64xf32, #tpu.memory_space<vmem>>, vector<1x64xf32>
    %13 = vector.broadcast %12 : vector<1x64xf32> to vector<8x64xf32>
    %14 = arith.addf %11, %13 : vector<8x64xf32>
    %cst_11 = arith.constant 0.000000e+00 : f32
    %15 = vector.broadcast %cst_11 : f32 to vector<8x64xf32>
    %16 = arith.maximumf %14, %15 : vector<8x64xf32>
    %17 = arith.truncf %16 : vector<8x64xf32> to vector<8x64xbf16>
    %c0_12 = arith.constant 0 : index
    %c0_13 = arith.constant 0 : index
    %18 = vector.load %arg6[%c0_12, %c0_13] : memref<64x36xbf16, #tpu.memory_space<vmem>>, vector<64x36xbf16>
    %cst_14 = arith.constant dense<0.000000e+00> : vector<8x36xf32>
    %19 = tpu.matmul %17, %18, %cst_14 {dimension_numbers = #tpu.dot_dimension_numbers<[1], [0], [0], [1], [0, 0, 1, 1], [], []>} : vector<8x64xbf16>, vector<64x36xbf16>, vector<8x36xf32> -> vector<8x36xf32>
    %c0_15 = arith.constant 0 : index
    %c0_16 = arith.constant 0 : index
    %20 = vector.load %arg7[%c0_15, %c0_16] : memref<1x36xf32, #tpu.memory_space<vmem>>, vector<1x36xf32>
    %21 = vector.broadcast %20 : vector<1x36xf32> to vector<8x36xf32>
    %22 = arith.addf %19, %21 : vector<8x36xf32>
    %cst_17 = arith.constant dense<0xFF800000> : vector<8xf32>
    %23 = vector.multi_reduction <maximumf>, %22, %cst_17 [1] : vector<8x36xf32> to vector<8xf32>
    %24 = vector.shape_cast %23 : vector<8xf32> to vector<8x1xf32>
    %25 = vector.broadcast %24 : vector<8x1xf32> to vector<8x36xf32>
    %26 = arith.subf %22, %25 : vector<8x36xf32>
    %27 = math.exp %26 : vector<8x36xf32>
    %cst_18 = arith.constant dense<0.000000e+00> : vector<8xf32>
    %28 = vector.multi_reduction <add>, %27, %cst_18 [1] : vector<8x36xf32> to vector<8xf32>
    %29 = vector.shape_cast %28 : vector<8xf32> to vector<8x1xf32>
    %30 = vector.broadcast %29 : vector<8x1xf32> to vector<8x36xf32>
    %31 = arith.divf %27, %30 : vector<8x36xf32>
    %c0_19 = arith.constant 0 : index
    %c0_20 = arith.constant 0 : index
    %32 = vector.load %arg8[%c0_19, %c0_20] : memref<8x36xf32, #tpu.memory_space<vmem>>, vector<8x36xf32>
    tpu.vector_store %arg8[%c0_19, %c0_20], %31 {strides = array<i32>} : memref<8x36xf32, #tpu.memory_space<vmem>>, vector<8x36xf32>,
    return
  }
  func.func @transform_0(%arg0: i32) -> (i32, i32) {
    %c0_i32 = arith.constant 0 : i32
    %c0_i32_0 = arith.constant 0 : i32
    return %arg0, %c0_i32 : i32, i32
  }
  func.func @transform_1(%arg0: i32) -> (i32, i32) {
    %c0_i32 = arith.constant 0 : i32
    %c0_i32_0 = arith.constant 0 : i32
    %c0_i32_1 = arith.constant 0 : i32
    return %c0_i32, %c0_i32_0 : i32, i32
  }
  func.func @transform_2(%arg0: i32) -> (i32, i32) {
    %c0_i32 = arith.constant 0 : i32
    %c0_i32_0 = arith.constant 0 : i32
    %c0_i32_1 = arith.constant 0 : i32
    return %c0_i32, %c0_i32_0 : i32, i32
  }
  func.func @transform_3(%arg0: i32) -> (i32, i32) {
    %c0_i32 = arith.constant 0 : i32
    %c0_i32_0 = arith.constant 0 : i32
    %c0_i32_1 = arith.constant 0 : i32
    return %c0_i32, %c0_i32_0 : i32, i32
  }
  func.func @transform_4(%arg0: i32) -> (i32, i32) {
    %c0_i32 = arith.constant 0 : i32
    %c0_i32_0 = arith.constant 0 : i32
    %c0_i32_1 = arith.constant 0 : i32
    return %c0_i32, %c0_i32_0 : i32, i32
  }
  func.func @transform_5(%arg0: i32) -> (i32, i32) {
    %c0_i32 = arith.constant 0 : i32
    %c0_i32_0 = arith.constant 0 : i32
    %c0_i32_1 = arith.constant 0 : i32
    return %c0_i32, %c0_i32_0 : i32, i32
  }
  func.func @transform_6(%arg0: i32) -> (i32, i32) {
    %c0_i32 = arith.constant 0 : i32
    %c0_i32_0 = arith.constant 0 : i32
    %c0_i32_1 = arith.constant 0 : i32
    return %c0_i32, %c0_i32_0 : i32, i32
  }
  func.func @transform_7(%arg0: i32) -> (i32, i32) {
    %c0_i32 = arith.constant 0 : i32
    %c0_i32_0 = arith.constant 0 : i32
    return %arg0, %c0_i32 : i32, i32
  }
}

</mosaic_0001>

<bundles_post_ra>
// kernel: tpu_custom_call.1
= control target key start
LH: loop header
LB: loop body
LE: loop exit
PB: predicated region body
PF: predicated region fallthrough
CT: control target
= control target key end

     0   :  { %vm58_vm0 = vcmask 1041408   ;;  %s465_s0 = inlined_call_operand.vmem [shape: f32[8,36], index: 0, kind: input, shape index: {}]   ;;  %s466_s1 = inlined_call_operand.vmem [shape: bf16[36,128], index: 1, kind: input, shape index: {}]   ;;  %s467_s2 = inlined_call_operand.vmem [shape: f32[1,128], index: 2, kind: input, shape index: {}]   ;;  %s468_s3 = inlined_call_operand.vmem [shape: bf16[128,64], index: 3, kind: input, shape index: {}]   ;;  %s469_s4 = inlined_call_operand.vmem [shape: f32[1,64], index: 4, kind: input, shape index: {}]   ;;  %s470_s5 = inlined_call_operand.vmem [shape: bf16[64,36], index: 5, kind: input, shape index: {}]   ;;  %s471_s6 = inlined_call_operand.vmem [shape: f32[1,36], index: 6, kind: input, shape index: {}]   ;;  %s472_s7 = inlined_call_operand.hbm [shape: f32[8,36], index: 7, kind: output, shape index: {}]  }
   0x1   :  { %v34_v0 = vld [vmem:[%s466_s1 + $0x10] sm:$0x3]  ;;  %v321_v2 = vld [vmem:[%s468_s3 + $0x38] sm:$0xff] }
   0x2   :  { %v48_v1 = vunpack.c.l.b16 %v34_v0  ;;  %145 = vmatpush.bf16.msra.mxu1 %v321_v2  ;;  %v320_v4 = vld [vmem:[%s468_s3 + $0x30] sm:$0xff] }
   0x4   :  { %v51_v3 = vpack.c.b16 %v48_v1, %v48_v1 }
   0x5   :  { %12 = vsyncpa [#allocation3], 0  ;;  %v313_v6 = vld [vmem:[%s466_s1 + $0x8] sm:$0xff]  ;;  %v312_v8 = vld [vmem:[%s466_s1] sm:$0xff]  ;;  %vm54_vm1 = vcmask 293888   ;;  %vm196_vm2 = vcmask 523264  }
   0x6   :  { %v60_v5 = vsel %vm58_vm0, %v51_v3, 0  ;;  %146 = vmatpush.bf16.msra.mxu1 %v320_v4  ;;  %v319_v7 = vld [vmem:[%s468_s3 + $0x28] sm:$0xff]  ;;  %v28_v9 = vld [vmem:[%s465_s0] sm:$0xff]  ;;  %v317_v12 = vld [vmem:[%s468_s3 + $0x18] sm:$0xff]  ;;  %s245_s13 = sshll.u32 %s472_s7, 4  ;;  %s246_s13 = int_to_ptr.hbm [resolvable:$true] %s245_s13 }
   0x7   :  { %67 = vmatpush.bf16.msra.mxu0 %v60_v5  ;;  %v318_v10 = vld [vmem:[%s468_s3 + $0x20] sm:$0xff]  ;;  %v29_v11 = vpack.c.bf16 %v28_v9, %v28_v9  ;;  %v316_v13 = vld [vmem:[%s468_s3 + $0x10] sm:$0xff]  ;;  %v315_v14 = vld [vmem:[%s468_s3 + $0x8] sm:$0xff] }
   0x8   :  { %v314_v15 = vld [vmem:[%s468_s3] sm:$0xff]  ;;  %v325_v16 = vld [vmem:[%s470_s5 + $0x18] sm:$0xff]  ;;  %v324_v17 = vld [vmem:[%s470_s5 + $0x10] sm:$0xff] }
   0x9   :  { %204 = vmatpush.bf16.msra.mxu2 %v325_v16  ;;  %v327_v18 = vld [vmem:[%s467_s2] ss:$0 sm:$0xff]  ;;  %v323_v24 = vld [vmem:[%s470_s5 + $0x8] sm:$0xff] }
   0xa   :  { %147 = vmatpush.bf16.msra.mxu1 %v319_v7  ;;  %v322_v25 = vld [vmem:[%s470_s5] sm:$0xff] }
   0xb   :  { %68 = vmatpush.bf16.msra.mxu0 %v313_v6  ;;  %v328_v26 = vld [vmem:[%s469_s4] ss:$0 sm:$0xff]  ;;  %s360_s4 = smov [#allocation2]  }
   0xc   :  { %v329_v32 = vld [vmem:[%s471_s6] ss:$0 sm:$0xff]  ;;  %s243_s5 = sshll.u32 %s360_s4, 4  ;;  %s244_s5 = int_to_ptr.vmem [resolvable:$true] %s243_s5 }
   0xd   :  { %205 = vmatpush.bf16.msra.mxu2 %v324_v17 }
   0xe   :  { %148 = vmatpush.bf16.msra.mxu1 %v318_v10 }
   0xf   :  { %69 = vmatpush.bf16.msra.mxu0 %v312_v8 }
  0x11   :  { %206 = vmatpush.bf16.msra.mxu2 %v323_v24 }
  0x12   :  { %262 = vmatmul.msk.bf16.vlgmr.msra.gmra.mxu0 %vm54_vm1, %v29_v11  ;;  %149 = vmatpush.bf16.msra.mxu1 %v317_v12 }
  0x15   :  { %207 = vmatpush.bf16.msra.mxu2 %v322_v25 }
  0x16   :  { %150 = vmatpush.bf16.msra.mxu1 %v316_v13 }
  0x1a   :  { %151 = vmatpush.bf16.msra.mxu1 %v315_v14 }
  0x1e   :  { %152 = vmatpush.bf16.msra.mxu1 %v314_v15 }
  0x8f   :  { %v71_v19 = vpop.f32.mrf.mxu0 }
  0x90   :  { %v72_v20 = vadd.f32 %v327_v18, %v71_v19 }
  0x92   :  { %v75_v21 = vmax.f32 %v72_v20, 0.0 }
  0x94   :  { %v76_v22 = vpack.c.bf16 %v75_v21, %v75_v21 }
  0x96   :  { %153 = vmatmul.bf16.vlgmr.msra.gmra.mxu1 %v76_v22 }
  0x97   :  { %v73_v23 = vpop.f32.mrf.mxu0 }
 0x113   :  { %v154_v27 = vpop.f32.mrf.mxu1 }
 0x114   :  { %v155_v28 = vadd.f32 %v328_v26, %v154_v27 }
 0x116   :  { %v158_v29 = vmax.f32 %v155_v28, 0.0 }
 0x118   :  { %v159_v30 = vpack.c.bf16 %v158_v29, %v158_v29 }
 0x11a   :  { %311 = vmatmul.msk.bf16.vlgmr.msra.gmra.mxu2 %vm196_vm2, %v159_v30 }
 0x11b   :  { %v156_v31 = vpop.f32.mrf.mxu1 }
 0x19d   :  { %v209_v33 = vpop.f32.mrf.mxu2 }
 0x19e   :  { %v210_v34 = vadd.f32 %v329_v32, %v209_v33 }
 0x1a0   :  { %v213_v35 = vsel %vm54_vm1, %v210_v34, -inf }
 0x1a1   :  { %214 = vmax.xlane.f32.xlu0 %v213_v35 }
 0x1a5   :  { %v211_v36 = vpop.f32.mrf.mxu2 }
 0x214   :  { %v215_v37 = vpop.xlane.xlu0 %214 }
 0x215   :  { %v216_v38 = vsub.f32 %v210_v34, %v215_v37 }
 0x217   :  { %v217_v39 = vmul.f32 1.442695, %v216_v38 }
 0x219   :  { %330 = vpow2.f32 %v217_v39 }
 0x21f   :  { %v331_v40 = vpop.eup %330 }
 0x220   :  { %v219_v41 = vsel %vm54_vm1, %v331_v40, 0.0 }
 0x221   :  { %220 = vadd.xlane.f32.xlu0 %v219_v41 }
 0x294   :  { %v221_v42 = vpop.xlane.xlu0 %220 }
 0x295   :  { %332 = vrcp.f32 %v221_v42  ;;  %v233_v46 = vand.u32 2147483648, %v221_v42  ;;  %v231_v48 = vand.u32 2147483647, %v221_v42  ;;  %vm227_vm4 = vweird.f32 %v221_v42 }
 0x297   :  { %v234_v50 = vor.u32 1.1754944e-38, %v233_v46  ;;  %vm232_vm6 = vcmp.eq.f32.partialorder %v231_v48, 8.507059e+37 }
 0x29b   :  { %v333_v43 = vpop.eup %332 }
 0x29c   :  { %v223_v44 = vmul.f32 %v333_v43, %v221_v42  ;;  %vm228_vm3 = vweird.f32 %v333_v43 }
 0x29d   :  { %vm229_vm5 = vmor %vm227_vm4, %vm228_vm3 }
 0x29e   :  { %v224_v45 = vsub.f32 1.0, %v223_v44 }
 0x2a0   :  { %v225_v47 = vmul.f32 %v333_v43, %v224_v45 }
 0x2a2   :  { %v226_v49 = vadd.f32 %v333_v43, %v225_v47 }
 0x2a4   :  { %v230_v51 = vsel %vm229_vm5, %v333_v43, %v226_v49 }
 0x2a5   :  { %v235_v52 = vsel %vm232_vm6, %v234_v50, %v230_v51 }
 0x2a6   :  { %v236_v53 = vmul.f32 %v331_v40, %v235_v52 }
 0x2a8   :  { %237 = vst.msk [vmem:[#allocation2] sm:$0xff] %vm54_vm1, %v236_v53 }
 0x2a9   :  { %248 = dma.vmem_to_hbm [thread:$0]  %s244_s5, 128, %s246_s13, [#allocation3]  }
 0x2aa   :  { %358 = dma.done.wait [#allocation3], 128  }
 0x2ab   :  { %359 = vsyncadd [#allocation3], 4294967168 }
 0x2ac   :  { %253 = vsyncpa [#allocation3], 1 }

</bundles_post_ra>
